<compile_context>
chip_gen: v5e
topology: v5e:2x2
jax: 0.10.0
libtpu: 0.0.40
codegen_flags: <defaults>
</compile_context>

<pallas_src>
import math
import functools

import jax
import jax.numpy as jnp
from jax import lax
from jax.experimental import pallas as pl
from jax.experimental.pallas import tpu as pltpu

SILU_SCALE = 1.0 / 0.6          # GemNet ScaledSiLU
INV_SQRT_2 = 1.0 / math.sqrt(2.0)
VMEM_LIMIT_BYTES = 48 * 1024 * 1024


def _scaled_silu(x):
    return jax.nn.silu(x) * SILU_SCALE


def _residual_apply(x, w1, w2):
    # GemNet ResidualLayer: (x + ScaledSiLU(ScaledSiLU(x W1) W2)) / sqrt(2)
    y = _scaled_silu(jnp.dot(x, w1, preferred_element_type=jnp.float32))
    y = _scaled_silu(jnp.dot(y, w2, preferred_element_type=jnp.float32))
    return (x + y) * INV_SQRT_2


def _row_tile(m, max_tile=512):
    return m if m <= max_tile else max_tile


def _cdiv(a, b):
    return -(-a // b)


def _cparams(semantics):
    return pltpu.CompilerParams(dimension_semantics=semantics,
                                vmem_limit_bytes=VMEM_LIMIT_BYTES)


# In-kernel one-hot builders (iota + compare + select: elementary VPU ops).
def _onehot_rows(idx_col, n_src):
    """(rows, 1) int32 -> (rows, n_src) f32; negative index -> all-zero row."""
    iota = lax.broadcasted_iota(jnp.int32, (idx_col.shape[0], n_src), 1)
    return jnp.where(iota == idx_col, 1.0, 0.0).astype(jnp.float32)


def _onehot_cols(idx_row, n_dst):
    """(1, cols) int32 -> (n_dst, cols) f32; [a, e] = (idx[e] == a)."""
    iota = lax.broadcasted_iota(jnp.int32, (n_dst, idx_row.shape[1]), 0)
    return jnp.where(iota == idx_row, 1.0, 0.0).astype(jnp.float32)


# ---------------------------------------------------------------------------
# Kernel B: fused edge pre-compute
#   x_ca_skip = ScaledSiLU(m @ W_ca)
#   x_ba_down = ScaledSiLU(((ScaledSiLU(m @ W_ba)) * (rbf3 @ W_rbf) * s) @ W_dn)
# ---------------------------------------------------------------------------
def _edge_pre_kernel(m_ref, rbf_ref, wca_ref, wba_ref, wrbf_ref, wdown_ref,
                     skip_ref, xba_ref, *, scale_rbf):
    m = m_ref[...]
    skip_ref[...] = _scaled_silu(
        jnp.dot(m, wca_ref[...], preferred_element_type=jnp.float32)
    ).astype(skip_ref.dtype)
    x_ba = _scaled_silu(jnp.dot(m, wba_ref[...],
                                preferred_element_type=jnp.float32))
    rbf_emb = jnp.dot(rbf_ref[...], wrbf_ref[...],
                      preferred_element_type=jnp.float32)
    x_ba = x_ba * rbf_emb * scale_rbf
    xba_ref[...] = _scaled_silu(
        jnp.dot(x_ba, wdown_ref[...], preferred_element_type=jnp.float32)
    ).astype(xba_ref.dtype)


def edge_precompute(m, rbf3, w_ca, w_ba, w_rbf, w_down, scale_rbf,
                    max_row_tile=512):
    n_edges, e_dim = m.shape
    r_dim = rbf3.shape[1]
    t_dim = w_down.shape[1]
    tm = _row_tile(n_edges, max_row_tile)
    grid = (_cdiv(n_edges, tm),)
    row = lambda i: (i, 0)
    const = lambda i: (0, 0)
    return pl.pallas_call(
        functools.partial(_edge_pre_kernel, scale_rbf=float(scale_rbf)),
        out_shape=(jax.ShapeDtypeStruct((n_edges, e_dim), jnp.float32),
                   jax.ShapeDtypeStruct((n_edges, t_dim), jnp.float32)),
        grid=grid,
        in_specs=[pl.BlockSpec((tm, e_dim), row),
                  pl.BlockSpec((tm, r_dim), row),
                  pl.BlockSpec((e_dim, e_dim), const),
                  pl.BlockSpec((e_dim, e_dim), const),
                  pl.BlockSpec((r_dim, e_dim), const),
                  pl.BlockSpec((e_dim, t_dim), const)],
        out_specs=(pl.BlockSpec((tm, e_dim), row),
                   pl.BlockSpec((tm, t_dim), row)),
        compiler_params=_cparams(("parallel",)),
    )(m, rbf3, w_ca, w_ba, w_rbf, w_down)


# ---------------------------------------------------------------------------
# Kernel A: fused triplet interaction
#   vectorized one-hot gather of x_ba rows -> m2 (VMEM only)
#   reordered cbf contraction -> single collapsed bilinear matmul (K=C*T)
#   -> concatenated up-projections [up_ca | up_ac]
# ---------------------------------------------------------------------------
def _triplet_kernel(gidx_ref, xba_ref, sph_ref, rbfw1_ref, wcb_ref, wup_ref,
                    xca_ref, xac_ref, m2_ref, ect_ref, flat_ref, *, scale_cbf):
    n_src, t_dim = xba_ref.shape
    kmax = gidx_ref.shape[1]
    c_dim = ect_ref.shape[1]
    e_dim = xca_ref.shape[1]

    x_ba = xba_ref[...]                                    # (nEdges, T) resident
    # Vectorized gather: one MXU matmul per triplet slot; idx < 0 (empty slot
    # or padding) produces an all-zero one-hot row, i.e. a zero message.
    for k in range(kmax):                                  # small static unroll
        idx_k = gidx_ref[:, pl.ds(k, 1)]                   # (te, 1) int32
        m2_ref[:, k, :] = jnp.dot(_onehot_rows(idx_k, n_src), x_ba,
                                  preferred_element_type=jnp.float32)

    # Reordered contraction (C <= T): eck first, then ect (2x fewer FLOPs).
    eck = jnp.einsum("ecs,esk->eck", rbfw1_ref[...], sph_ref[...],
                     preferred_element_type=jnp.float32)   # (te, C, K)
    ect_ref[...] = jnp.einsum("eck,ekt->ect", eck, m2_ref[...],
                              preferred_element_type=jnp.float32)

    # Bilinear collapsed into ONE matmul with K = C*T (full MXU cadence).
    for c in range(c_dim):                                 # small static unroll
        flat_ref[:, pl.ds(c * t_dim, t_dim)] = ect_ref[:, c, :]
    x = jnp.dot(flat_ref[...], wcb_ref[...],
                preferred_element_type=jnp.float32) * scale_cbf     # (te, B)

    # Fused up-projections (weights concatenated along N: [up_ca | up_ac]).
    y = _scaled_silu(jnp.dot(x, wup_ref[...],
                             preferred_element_type=jnp.float32))   # (te, 2E)
    xca_ref[...] = y[:, :e_dim].astype(xca_ref.dtype)
    xac_ref[...] = y[:, e_dim:].astype(xac_ref.dtype)


def triplet_interaction(gather_idx, x_ba, sph, rbf_w1, w_cb_flat, w_up_cat,
                        scale_cbf, max_row_tile=512):
    n_edges, t_dim = x_ba.shape
    s_dim, kmax = sph.shape[1], sph.shape[2]
    c_dim = rbf_w1.shape[1]
    ct_dim, b_dim = w_cb_flat.shape
    e2 = w_up_cat.shape[1]
    e_dim = e2 // 2
    te = _row_tile(n_edges, max_row_tile)
    grid = (_cdiv(n_edges, te),)
    return pl.pallas_call(
        functools.partial(_triplet_kernel, scale_cbf=float(scale_cbf)),
        out_shape=(jax.ShapeDtypeStruct((n_edges, e_dim), jnp.float32),
                   jax.ShapeDtypeStruct((n_edges, e_dim), jnp.float32)),
        grid=grid,
        in_specs=[pl.BlockSpec((te, kmax), lambda i: (i, 0)),      # gather idx
                  pl.BlockSpec((n_edges, t_dim), lambda i: (0, 0)),  # x_ba resident
                  pl.BlockSpec((te, s_dim, kmax), lambda i: (i, 0, 0)),
                  pl.BlockSpec((te, c_dim, s_dim), lambda i: (i, 0, 0)),
                  pl.BlockSpec((ct_dim, b_dim), lambda i: (0, 0)),
                  pl.BlockSpec((b_dim, e2), lambda i: (0, 0))],
        out_specs=(pl.BlockSpec((te, e_dim), lambda i: (i, 0)),
                   pl.BlockSpec((te, e_dim), lambda i: (i, 0))),
        scratch_shapes=[pltpu.VMEM((te, kmax, t_dim), jnp.float32),
                        pltpu.VMEM((te, c_dim, t_dim), jnp.float32),
                        pltpu.VMEM((te, c_dim * t_dim), jnp.float32)],
        compiler_params=_cparams(("parallel",)),
    )(gather_idx, x_ba, sph, rbf_w1, w_cb_flat, w_up_cat)


# ---------------------------------------------------------------------------
# Kernel C: in-kernel id_swap gather + merge branches + both residual stacks
#           + atom-rbf hadamard
# ---------------------------------------------------------------------------
def _merge_kernel(m_ref, skip_ref, xca_ref, xacfull_ref, idsw_ref, rbf_ref,
                  wb1_ref, wb2_ref, wa1_ref, wa2_ref, wrbf_ref,
                  mnew_ref, xm_ref, *, n_before, n_after):
    n_src = xacfull_ref.shape[0]
    x_ac = jnp.dot(_onehot_rows(idsw_ref[...], n_src), xacfull_ref[...],
                   preferred_element_type=jnp.float32)        # x_ac[id_swap]
    x3 = (xca_ref[...] + x_ac) * INV_SQRT_2
    x = (skip_ref[...] + x3) * INV_SQRT_2
    for l in range(n_before):
        x = _residual_apply(x, wb1_ref[l], wb2_ref[l])
    m_new = (m_ref[...] + x) * INV_SQRT_2
    for l in range(n_after):
        m_new = _residual_apply(m_new, wa1_ref[l], wa2_ref[l])
    mnew_ref[...] = m_new.astype(mnew_ref.dtype)
    mlp_rbf = jnp.dot(rbf_ref[...], wrbf_ref[...],
                      preferred_element_type=jnp.float32)     # linear (no act)
    xm_ref[...] = (m_new * mlp_rbf).astype(xm_ref.dtype)


def merge_and_residuals(m, x_ca_skip, x_ca, x_ac_full, id_swap_col, rbf_h,
                        wb1, wb2, wa1, wa2, w_atom_rbf, n_before, n_after,
                        max_row_tile=512):
    n_edges, e_dim = m.shape
    r_dim = rbf_h.shape[1]
    tm = _row_tile(n_edges, max_row_tile)
    grid = (_cdiv(n_edges, tm),)
    row = lambda i: (i, 0)
    const2 = lambda i: (0, 0)
    const3 = lambda i: (0, 0, 0)
    nb, na = wb1.shape[0], wa1.shape[0]
    return pl.pallas_call(
        functools.partial(_merge_kernel, n_before=n_before, n_after=n_after),
        out_shape=(jax.ShapeDtypeStruct((n_edges, e_dim), jnp.float32),
                   jax.ShapeDtypeStruct((n_edges, e_dim), jnp.float32)),
        grid=grid,
        in_specs=[pl.BlockSpec((tm, e_dim), row),
                  pl.BlockSpec((tm, e_dim), row),
                  pl.BlockSpec((tm, e_dim), row),
                  pl.BlockSpec((n_edges, e_dim), const2),   # x_ac resident
                  pl.BlockSpec((tm, 1), row),               # id_swap column
                  pl.BlockSpec((tm, r_dim), row),
                  pl.BlockSpec((nb, e_dim, e_dim), const3),
                  pl.BlockSpec((nb, e_dim, e_dim), const3),
                  pl.BlockSpec((na, e_dim, e_dim), const3),
                  pl.BlockSpec((na, e_dim, e_dim), const3),
                  pl.BlockSpec((r_dim, e_dim), const2)],
        out_specs=(pl.BlockSpec((tm, e_dim), row),
                   pl.BlockSpec((tm, e_dim), row)),
        compiler_params=_cparams(("parallel",)),
    )(m, x_ca_skip, x_ca, x_ac_full, id_swap_col, rbf_h,
      wb1, wb2, wa1, wa2, w_atom_rbf)


# ---------------------------------------------------------------------------
# Kernel D: edge -> atom segment sum as per-tile one-hot MXU matmuls
# ---------------------------------------------------------------------------
def _segment_sum_kernel(idxt_ref, xm_ref, out_ref, *, n_edges, scale):
    step = pl.program_id(0)

    @pl.when(step == 0)
    def _():
        out_ref[...] = jnp.zeros_like(out_ref)

    n_atoms = out_ref.shape[0]
    te = xm_ref.shape[0]
    onehot_t = _onehot_cols(idxt_ref[...], n_atoms)            # (nAtoms, te)
    # Mask rows past n_edges (last partial block padding may be garbage).
    rows = lax.broadcasted_iota(jnp.int32, xm_ref.shape, 0) + step * te
    xm = jnp.where(rows < n_edges, xm_ref[...], 0.0)
    out_ref[...] += jnp.dot(onehot_t, xm,
                            preferred_element_type=jnp.float32) * scale


def atom_segment_sum(idx_t_row, xm, n_atoms, scale, max_row_tile=512):
    # TODO(synk): on v7x shard this reduction across both TensorCores
    #             (grid (2, nchunks) + per-core partials combined downstream).
    n_edges, e_dim = xm.shape
    te = _row_tile(n_edges, max_row_tile)
    grid = (_cdiv(n_edges, te),)
    return pl.pallas_call(
        functools.partial(_segment_sum_kernel, n_edges=n_edges,
                          scale=float(scale)),
        out_shape=jax.ShapeDtypeStruct((n_atoms, e_dim), jnp.float32),
        grid=grid,
        in_specs=[pl.BlockSpec((1, te), lambda i: (0, i)),
                  pl.BlockSpec((te, e_dim), lambda i: (i, 0))],
        out_specs=pl.BlockSpec((n_atoms, e_dim), lambda i: (0, 0)),
        compiler_params=_cparams(("arbitrary",)),
    )(idx_t_row, xm)


# ---------------------------------------------------------------------------
# Kernel E: atom MLP + residual stack + skip connection
# ---------------------------------------------------------------------------
def _atom_update_kernel(x2_ref, h_ref, wd_ref, wr1_ref, wr2_ref, hout_ref,
                        *, n_res, skip_factor):
    xa = _scaled_silu(jnp.dot(x2_ref[...], wd_ref[...],
                              preferred_element_type=jnp.float32))
    for l in range(n_res):
        xa = _residual_apply(xa, wr1_ref[l], wr2_ref[l])
    hout_ref[...] = ((h_ref[...] + xa) * skip_factor).astype(hout_ref.dtype)


def atom_update(x2, h, w_dense, wr1, wr2, n_res, skip_factor,
                max_row_tile=512):
    n_atoms, a_dim = h.shape
    e_dim = x2.shape[1]
    ta = _row_tile(n_atoms, max_row_tile)
    grid = (_cdiv(n_atoms, ta),)
    row = lambda i: (i, 0)
    const2 = lambda i: (0, 0)
    const3 = lambda i: (0, 0, 0)
    nr = wr1.shape[0]
    return pl.pallas_call(
        functools.partial(_atom_update_kernel, n_res=n_res,
                          skip_factor=float(skip_factor)),
        out_shape=jax.ShapeDtypeStruct((n_atoms, a_dim), jnp.float32),
        grid=grid,
        in_specs=[pl.BlockSpec((ta, e_dim), row),
                  pl.BlockSpec((ta, a_dim), row),
                  pl.BlockSpec((e_dim, a_dim), const2),
                  pl.BlockSpec((nr, a_dim, a_dim), const3),
                  pl.BlockSpec((nr, a_dim, a_dim), const3)],
        out_specs=pl.BlockSpec((ta, a_dim), row),
        compiler_params=_cparams(("parallel",)),
    )(x2, h, w_dense, wr1, wr2)


# ---------------------------------------------------------------------------
# Kernel F: EdgeEmbedding with in-kernel h_s / h_t gathers (split concat
#           weight -> 3 accumulated matmuls) + residual_m stack + final skip
# ---------------------------------------------------------------------------
def _edge_embed_kernel(h_ref, idxs_ref, idxt_ref, m_ref, ws_ref, wt_ref,
                       wm_ref, wr1_ref, wr2_ref, out_ref, *, n_res):
    h_all = h_ref[...]                                        # (nAtoms, A) resident
    n_atoms = h_all.shape[0]
    h_s = jnp.dot(_onehot_rows(idxs_ref[...], n_atoms), h_all,
                  preferred_element_type=jnp.float32)
    h_t = jnp.dot(_onehot_rows(idxt_ref[...], n_atoms), h_all,
                  preferred_element_type=jnp.float32)
    y = jnp.dot(h_s, ws_ref[...], preferred_element_type=jnp.float32)
    y = y + jnp.dot(h_t, wt_ref[...], preferred_element_type=jnp.float32)
    y = y + jnp.dot(m_ref[...], wm_ref[...], preferred_element_type=jnp.float32)
    y = _scaled_silu(y)
    for l in range(n_res):
        y = _residual_apply(y, wr1_ref[l], wr2_ref[l])
    out_ref[...] = ((m_ref[...] + y) * INV_SQRT_2).astype(out_ref.dtype)


def edge_embed_and_residuals(h_new, idx_s_col, idx_t_col, m_new, w_s, w_t,
                             w_m, wr1, wr2, n_res, max_row_tile=512):
    n_edges, e_dim = m_new.shape
    n_atoms, a_dim = h_new.shape
    tm = _row_tile(n_edges, max_row_tile)
    grid = (_cdiv(n_edges, tm),)
    row = lambda i: (i, 0)
    const2 = lambda i: (0, 0)
    const3 = lambda i: (0, 0, 0)
    nr = wr1.shape[0]
    return pl.pallas_call(
        functools.partial(_edge_embed_kernel, n_res=n_res),
        out_shape=jax.ShapeDtypeStruct((n_edges, e_dim), jnp.float32),
        grid=grid,
        in_specs=[pl.BlockSpec((n_atoms, a_dim), const2),     # h resident
                  pl.BlockSpec((tm, 1), row),
                  pl.BlockSpec((tm, 1), row),
                  pl.BlockSpec((tm, e_dim), row),
                  pl.BlockSpec((a_dim, e_dim), const2),
                  pl.BlockSpec((a_dim, e_dim), const2),
                  pl.BlockSpec((e_dim, e_dim), const2),
                  pl.BlockSpec((nr, e_dim, e_dim), const3),
                  pl.BlockSpec((nr, e_dim, e_dim), const3)],
        out_specs=pl.BlockSpec((tm, e_dim), row),
        compiler_params=_cparams(("parallel",)),
    )(h_new, idx_s_col, idx_t_col, m_new, w_s, w_t, w_m, wr1, wr2)


# ------------------------- forward pass (Pallas) ---------------------------
def interaction_block_forward(params, cfg, h, m, rbf3, cbf3, id3_ragged_idx,
                              id_swap, id3_ba, id3_ca, rbf_h, idx_s, idx_t,
                              max_row_tile=512):
    rbf_w1, sph = cbf3
    n_atoms = h.shape[0]
    n_edges, _ = m.shape
    kmax = sph.shape[-1]
    fp = params["fused"]

    # (B) fused edge pre-compute: dense_ca skip branch + triplet down-proj.
    x_ca_skip, x_ba_down = edge_precompute(
        m, rbf3, params["dense_ca"], params["trip_dense_ba"],
        params["trip_mlp_rbf"], params["trip_down"], params["scale_rbf"],
        max_row_tile)

    te = _row_tile(n_edges, max_row_tile)
    pe = _cdiv(n_edges, te) * te

    # Densify the ragged triplet structure into per-(edge, slot) gather
    # indices (int32 only; exactly the reference's scatter-set semantics).
    gather_idx = jnp.full((pe, kmax), -1, jnp.int32).at[
        id3_ca.astype(jnp.int32), id3_ragged_idx.astype(jnp.int32)
    ].set(id3_ba.astype(jnp.int32))

    # (A) fused triplet interaction (vectorized gather + reordered cbf
    #     contraction + collapsed bilinear + concatenated up-projections).
    x_ca, x_ac = triplet_interaction(
        gather_idx, x_ba_down, sph, rbf_w1, fp["trip_bilinear_flat"],
        fp["trip_up_cat"], params["scale_cbf_sum"], max_row_tile)

    def _pad_col(v, fill):          # (nEdges,) -> (pe, 1) int32
        return jnp.pad(v.astype(jnp.int32), (0, pe - n_edges),
                       constant_values=fill).reshape(pe, 1)

    # (C) in-kernel id_swap gather + merge branches + residual stacks +
    #     atom-rbf hadamard.
    m_new, xm = merge_and_residuals(
        m, x_ca_skip, x_ca, x_ac, _pad_col(id_swap, 0), rbf_h,
        fp["before_w1"], fp["before_w2"], fp["after_w1"], fp["after_w2"],
        params["atom_dense_rbf"], cfg["num_before_skip"],
        cfg["num_after_skip"], max_row_tile)

    # (D) edge -> atom aggregation as per-tile one-hot MXU matmuls.
    idx_t_row = jnp.pad(idx_t.astype(jnp.int32), (0, pe - n_edges),
                        constant_values=-1).reshape(1, pe)
    x2 = atom_segment_sum(idx_t_row, xm, n_atoms, params["scale_sum"],
                          max_row_tile)

    # (E) atom MLP + residual stack + skip connection.
    h_new = atom_update(x2, h, params["atom_dense1"], fp["atom_w1"],
                        fp["atom_w2"], cfg["num_atom"],
                        cfg["skip_connection_factor"], max_row_tile)

    # (F) EdgeEmbedding (split concat weight, in-kernel h_s/h_t gathers)
    #     + residual_m stack + final skip.
    m_out = edge_embed_and_residuals(
        h_new, _pad_col(idx_s, 0), _pad_col(idx_t, 0), m_new,
        fp["concat_ws"], fp["concat_wt"], fp["concat_wm"],
        fp["residual_m_w1"], fp["residual_m_w2"], cfg["num_concat"],
        max_row_tile)
    return h_new, m_out


# ---------------------- pure-JAX reference (for checking) ------------------
def reference_forward(params, cfg, h, m, rbf3, cbf3, id3_ragged_idx, id_swap,
                      id3_ba, id3_ca, rbf_h, idx_s, idx_t):
    rbf_w1, sph = cbf3
    n_atoms = h.shape[0]
    n_edges = m.shape[0]
    kmax = sph.shape[-1]
    t_dim = cfg["emb_size_trip"]

    def dense(x, w, act):
        y = x @ w
        return _scaled_silu(y) if act else y

    def residual(x, ws):
        w1, w2 = ws
        y = dense(dense(x, w1, True), w2, True)
        return (x + y) * INV_SQRT_2

    x_ca_skip = dense(m, params["dense_ca"], True)
    x_ba = dense(m, params["trip_dense_ba"], True)
    rbf_emb = dense(rbf3, params["trip_mlp_rbf"], False)
    x_ba = (x_ba * rbf_emb) * params["scale_rbf"]
    x_ba = dense(x_ba, params["trip_down"], True)
    x_ba_trip = x_ba[id3_ba]
    m2 = jnp.zeros((n_edges, kmax, t_dim), x_ba.dtype).at[
        id3_ca, id3_ragged_idx].set(x_ba_trip)
    sum_k = jnp.einsum("esk,ekt->est", sph, m2)
    rw = jnp.einsum("ecs,est->ect", rbf_w1, sum_k)
    x = jnp.einsum("ect,tco->eo", rw,
                   params["trip_bilinear_3d"]) * params["scale_cbf_sum"]
    x_ca = dense(x, params["trip_up_ca"], True)
    x_ac = dense(x, params["trip_up_ac"], True)[id_swap]
    x3 = (x_ca + x_ac) * INV_SQRT_2

    x = (x_ca_skip + x3) * INV_SQRT_2
    for ws in params["layers_before_skip"]:
        x = residual(x, ws)
    m_new = (m + x) * INV_SQRT_2
    for ws in params["layers_after_skip"]:
        m_new = residual(m_new, ws)

    mlp_rbf = dense(rbf_h, params["atom_dense_rbf"], False)
    xm = m_new * mlp_rbf
    x2 = jnp.zeros((n_atoms, xm.shape[1]), xm.dtype).at[idx_t].add(xm)
    x2 = x2 * params["scale_sum"]
    xa = dense(x2, params["atom_dense1"], True)
    for ws in params["atom_residual"]:
        xa = residual(xa, ws)
    h_new = (h + xa) * cfg["skip_connection_factor"]

    m_st = jnp.concatenate([h_new[idx_s], h_new[idx_t], m_new], axis=-1)
    m2e = dense(m_st, params["concat_dense"], True)
    for ws in params["residual_m"]:
        m2e = residual(m2e, ws)
    m_out = (m_new + m2e) * INV_SQRT_2
    return h_new, m_out


# ----------------------------- parameters -----------------------------------
def init_params(key, cfg):
    a_dim, e_dim = cfg["emb_size_atom"], cfg["emb_size_edge"]
    t_dim, r_dim = cfg["emb_size_trip"], cfg["emb_size_rbf"]
    c_dim, b_dim = cfg["emb_size_cbf"], cfg["emb_size_bil_trip"]

    keys = iter(jax.random.split(key, 64))

    def w(shape):
        fan_in = shape[0]
        return jax.random.normal(next(keys), shape, jnp.float32) / jnp.sqrt(
            jnp.float32(fan_in))

    p = {
        "dense_ca": w((e_dim, e_dim)),
        "trip_dense_ba": w((e_dim, e_dim)),
        "trip_mlp_rbf": w((r_dim, e_dim)),
        "trip_down": w((e_dim, t_dim)),
        "trip_up_ca": w((b_dim, e_dim)),
        "trip_up_ac": w((b_dim, e_dim)),
        "trip_bilinear_3d": w((t_dim, c_dim, b_dim)),     # (trip, cbf, bil)
        "layers_before_skip": [(w((e_dim, e_dim)), w((e_dim, e_dim)))
                               for _ in range(cfg["num_before_skip"])],
        "layers_after_skip": [(w((e_dim, e_dim)), w((e_dim, e_dim)))
                              for _ in range(cfg["num_after_skip"])],
        "atom_dense_rbf": w((r_dim, e_dim)),
        "atom_dense1": w((e_dim, a_dim)),
        "atom_residual": [(w((a_dim, a_dim)), w((a_dim, a_dim)))
                          for _ in range(cfg["num_atom"])],
        "concat_dense": w((2 * a_dim + e_dim, e_dim)),
        "residual_m": [(w((e_dim, e_dim)), w((e_dim, e_dim)))
                       for _ in range(cfg["num_concat"])],
        "scale_rbf": 0.9,
        "scale_cbf_sum": 0.8,
        "scale_sum": 0.7,
    }
    return p


def fuse_params(p, cfg):
    """Derive the kernel-friendly (stacked / concatenated / split) weights."""
    a_dim, e_dim = cfg["emb_size_atom"], cfg["emb_size_edge"]
    t_dim, c_dim = cfg["emb_size_trip"], cfg["emb_size_cbf"]
    b_dim = cfg["emb_size_bil_trip"]

    def stack(pairs, d):
        if len(pairs) == 0:
            z = jnp.zeros((1, d, d), jnp.float32)
            return z, z
        return (jnp.stack([w1 for w1, _ in pairs]),
                jnp.stack([w2 for _, w2 in pairs]))

    bw1, bw2 = stack(p["layers_before_skip"], e_dim)
    aw1, aw2 = stack(p["layers_after_skip"], e_dim)
    rw1, rw2 = stack(p["residual_m"], e_dim)
    atw1, atw2 = stack(p["atom_residual"], a_dim)
    # flat[c*T + t, b] == W3d[t, c, b]  (matches the kernel's (te, C*T) packing)
    w_flat = jnp.transpose(p["trip_bilinear_3d"], (1, 0, 2)).reshape(
        c_dim * t_dim, b_dim)
    return {
        "trip_bilinear_flat": w_flat,
        "trip_up_cat": jnp.concatenate([p["trip_up_ca"], p["trip_up_ac"]],
                                       axis=1),
        "before_w1": bw1, "before_w2": bw2,
        "after_w1": aw1, "after_w2": aw2,
        "residual_m_w1": rw1, "residual_m_w2": rw2,
        "atom_w1": atw1, "atom_w2": atw2,
        "concat_ws": p["concat_dense"][:a_dim],
        "concat_wt": p["concat_dense"][a_dim:2 * a_dim],
        "concat_wm": p["concat_dense"][2 * a_dim:],
    }


# --------------------------------- main -------------------------------------
if __name__ == "__main__":
    cfg = dict(
        emb_size_atom=32, emb_size_edge=32, emb_size_trip=16,
        emb_size_rbf=16, emb_size_cbf=8, emb_size_bil_trip=16,
        num_before_skip=1, num_after_skip=1, num_concat=1, num_atom=2,
        skip_connection_factor=2.0 ** (-0.5),
    )
    nAtoms, nEdges, Kmax, nSph = 16, 32, 4, 8
    nTriplets = nEdges * Kmax   # fully dense ragged structure for the demo

    key = jax.random.PRNGKey(0)
    kp, kd = jax.random.split(key)
    params = init_params(kp, cfg)
    params["fused"] = fuse_params(params, cfg)

    ks = iter(jax.random.split(kd, 16))
    h = jax.random.normal(next(ks), (nAtoms, cfg["emb_size_atom"]), jnp.float32)
    m = jax.random.normal(next(ks), (nEdges, cfg["emb_size_edge"]), jnp.float32)
    rbf3 = jax.random.normal(next(ks), (nEdges, cfg["emb_size_rbf"]), jnp.float32)
    rbf_h = jax.random.normal(next(ks), (nEdges, cfg["emb_size_rbf"]), jnp.float32)
    # cbf3 is the output of EfficientInteractionDownProjection: (rbf_W1, sph)
    rbf_W1 = jax.random.normal(next(ks), (nEdges, cfg["emb_size_cbf"], nSph),
                               jnp.float32)
    sph = jax.random.normal(next(ks), (nEdges, nSph, Kmax), jnp.float32)
    cbf3 = (rbf_W1, sph)

    perm = jax.random.permutation(next(ks), nTriplets).astype(jnp.int32)
    id3_ca = (jnp.arange(nTriplets, dtype=jnp.int32) // Kmax)[perm]
    id3_ragged_idx = (jnp.arange(nTriplets, dtype=jnp.int32) % Kmax)[perm]
    id3_ba = jax.random.randint(next(ks), (nTriplets,), 0, nEdges, dtype=jnp.int32)
    id_swap = jax.random.permutation(next(ks), nEdges).astype(jnp.int32)
    idx_s = jax.random.randint(next(ks), (nEdges,), 0, nAtoms, dtype=jnp.int32)
    idx_t = jax.random.randint(next(ks), (nEdges,), 0, nAtoms, dtype=jnp.int32)

    h_out, m_out = interaction_block_forward(
        params, cfg, h, m, rbf3, cbf3, id3_ragged_idx, id_swap,
        id3_ba, id3_ca, rbf_h, idx_s, idx_t)
    jax.block_until_ready((h_out, m_out))

    h_ref, m_ref = reference_forward(
        params, cfg, h, m, rbf3, cbf3, id3_ragged_idx, id_swap,
        id3_ba, id3_ca, rbf_h, idx_s, idx_t)

    assert h_out.shape == (nAtoms, cfg["emb_size_atom"])
    assert m_out.shape == (nEdges, cfg["emb_size_edge"])
    assert jnp.allclose(h_out, h_ref, atol=2e-3, rtol=2e-3)
    assert jnp.allclose(m_out, m_ref, atol=2e-3, rtol=2e-3)
    print("KERNEL_OK")
</pallas_src>

<mosaic_0001>
module attributes {stable_mosaic.version = 11 : i64} {
  func.func @_edge_pre_kernel(%arg0: i32, %arg1: memref<32x32xf32, #tpu.memory_space<vmem>>, %arg2: memref<32x16xf32, #tpu.memory_space<vmem>>, %arg3: memref<32x32xf32, #tpu.memory_space<vmem>>, %arg4: memref<32x32xf32, #tpu.memory_space<vmem>>, %arg5: memref<16x32xf32, #tpu.memory_space<vmem>>, %arg6: memref<32x16xf32, #tpu.memory_space<vmem>>, %arg7: memref<32x32xf32, #tpu.memory_space<vmem>>, %arg8: memref<32x16xf32, #tpu.memory_space<vmem>>) attributes {dimension_semantics = [#tpu.dimension_semantics<parallel>], iteration_bounds = array<i64: 1>, scalar_prefetch = 0 : i64, scratch_operands = 0 : i64, tpu.core_type = #tpu.core_type<tc>, window_params = [{transform_indices = @transform_0, window_bounds = array<i64: 32, 32>}, {transform_indices = @transform_1, window_bounds = array<i64: 32, 16>}, {pipeline_mode = #tpu.pipeline_mode<synchronous>, transform_indices = @transform_2, window_bounds = array<i64: 32, 32>}, {pipeline_mode = #tpu.pipeline_mode<synchronous>, transform_indices = @transform_3, window_bounds = array<i64: 32, 32>}, {pipeline_mode = #tpu.pipeline_mode<synchronous>, transform_indices = @transform_4, window_bounds = array<i64: 16, 32>}, {pipeline_mode = #tpu.pipeline_mode<synchronous>, transform_indices = @transform_5, window_bounds = array<i64: 32, 16>}, {transform_indices = @transform_6, window_bounds = array<i64: 32, 32>}, {transform_indices = @transform_7, window_bounds = array<i64: 32, 16>}]} {
    %c0 = arith.constant 0 : index
    %c0_0 = arith.constant 0 : index
    %0 = vector.load %arg1[%c0, %c0_0] : memref<32x32xf32, #tpu.memory_space<vmem>>, vector<32x32xf32>
    %c0_1 = arith.constant 0 : index
    %c0_2 = arith.constant 0 : index
    %1 = vector.load %arg3[%c0_1, %c0_2] : memref<32x32xf32, #tpu.memory_space<vmem>>, vector<32x32xf32>
    %cst = arith.constant dense<0.000000e+00> : vector<32x32xf32>
    %2 = tpu.matmul %0, %1, %cst {dimension_numbers = #tpu.dot_dimension_numbers<[1], [0], [0], [1], [0, 0, 1, 1], [], []>} : vector<32x32xf32>, vector<32x32xf32>, vector<32x32xf32> -> vector<32x32xf32>
    %3 = arith.negf %2 : vector<32x32xf32>
    %4 = math.exp %3 : vector<32x32xf32>
    %cst_3 = arith.constant 1.000000e+00 : f32
    %5 = vector.broadcast %cst_3 : f32 to vector<32x32xf32>
    %6 = arith.addf %5, %4 : vector<32x32xf32>
    %7 = arith.divf %5, %6 : vector<32x32xf32>
    %8 = arith.mulf %2, %7 : vector<32x32xf32>
    %cst_4 = arith.constant 1.66666663 : f32
    %9 = vector.broadcast %cst_4 : f32 to vector<32x32xf32>
    %10 = arith.mulf %8, %9 : vector<32x32xf32>
    %c0_5 = arith.constant 0 : index
    %c0_6 = arith.constant 0 : index
    %11 = vector.load %arg7[%c0_5, %c0_6] : memref<32x32xf32, #tpu.memory_space<vmem>>, vector<32x32xf32>
    tpu.vector_store %arg7[%c0_5, %c0_6], %10 {strides = array<i32>} : memref<32x32xf32, #tpu.memory_space<vmem>>, vector<32x32xf32>,
    %c0_7 = arith.constant 0 : index
    %c0_8 = arith.constant 0 : index
    %12 = vector.load %arg4[%c0_7, %c0_8] : memref<32x32xf32, #tpu.memory_space<vmem>>, vector<32x32xf32>
    %cst_9 = arith.constant dense<0.000000e+00> : vector<32x32xf32>
    %13 = tpu.matmul %0, %12, %cst_9 {dimension_numbers = #tpu.dot_dimension_numbers<[1], [0], [0], [1], [0, 0, 1, 1], [], []>} : vector<32x32xf32>, vector<32x32xf32>, vector<32x32xf32> -> vector<32x32xf32>
    %14 = arith.negf %13 : vector<32x32xf32>
    %15 = math.exp %14 : vector<32x32xf32>
    %cst_10 = arith.constant 1.000000e+00 : f32
    %16 = vector.broadcast %cst_10 : f32 to vector<32x32xf32>
    %17 = arith.addf %16, %15 : vector<32x32xf32>
    %18 = arith.divf %16, %17 : vector<32x32xf32>
    %19 = arith.mulf %13, %18 : vector<32x32xf32>
    %cst_11 = arith.constant 1.66666663 : f32
    %20 = vector.broadcast %cst_11 : f32 to vector<32x32xf32>
    %21 = arith.mulf %19, %20 : vector<32x32xf32>
    %c0_12 = arith.constant 0 : index
    %c0_13 = arith.constant 0 : index
    %22 = vector.load %arg2[%c0_12, %c0_13] : memref<32x16xf32, #tpu.memory_space<vmem>>, vector<32x16xf32>
    %c0_14 = arith.constant 0 : index
    %c0_15 = arith.constant 0 : index
    %23 = vector.load %arg5[%c0_14, %c0_15] : memref<16x32xf32, #tpu.memory_space<vmem>>, vector<16x32xf32>
    %cst_16 = arith.constant dense<0.000000e+00> : vector<32x32xf32>
    %24 = tpu.matmul %22, %23, %cst_16 {dimension_numbers = #tpu.dot_dimension_numbers<[1], [0], [0], [1], [0, 0, 1, 1], [], []>} : vector<32x16xf32>, vector<16x32xf32>, vector<32x32xf32> -> vector<32x32xf32>
    %25 = arith.mulf %21, %24 : vector<32x32xf32>
    %cst_17 = arith.constant 0.899999976 : f32
    %26 = vector.broadcast %cst_17 : f32 to vector<32x32xf32>
    %27 = arith.mulf %25, %26 : vector<32x32xf32>
    %c0_18 = arith.constant 0 : index
    %c0_19 = arith.constant 0 : index
    %28 = vector.load %arg6[%c0_18, %c0_19] : memref<32x16xf32, #tpu.memory_space<vmem>>, vector<32x16xf32>
    %cst_20 = arith.constant dense<0.000000e+00> : vector<32x16xf32>
    %29 = tpu.matmul %27, %28, %cst_20 {dimension_numbers = #tpu.dot_dimension_numbers<[1], [0], [0], [1], [0, 0, 1, 1], [], []>} : vector<32x32xf32>, vector<32x16xf32>, vector<32x16xf32> -> vector<32x16xf32>
    %30 = arith.negf %29 : vector<32x16xf32>
    %31 = math.exp %30 : vector<32x16xf32>
    %cst_21 = arith.constant 1.000000e+00 : f32
    %32 = vector.broadcast %cst_21 : f32 to vector<32x16xf32>
    %33 = arith.addf %32, %31 : vector<32x16xf32>
    %34 = arith.divf %32, %33 : vector<32x16xf32>
    %35 = arith.mulf %29, %34 : vector<32x16xf32>
    %cst_22 = arith.constant 1.66666663 : f32
    %36 = vector.broadcast %cst_22 : f32 to vector<32x16xf32>
    %37 = arith.mulf %35, %36 : vector<32x16xf32>
    %c0_23 = arith.constant 0 : index
    %c0_24 = arith.constant 0 : index
    %38 = vector.load %arg8[%c0_23, %c0_24] : memref<32x16xf32, #tpu.memory_space<vmem>>, vector<32x16xf32>
    tpu.vector_store %arg8[%c0_23, %c0_24], %37 {strides = array<i32>} : memref<32x16xf32, #tpu.memory_space<vmem>>, vector<32x16xf32>,
    return
  }
  func.func @transform_0(%arg0: i32) -> (i32, i32) {
    %c0_i32 = arith.constant 0 : i32
    %c0_i32_0 = arith.constant 0 : i32
    return %arg0, %c0_i32 : i32, i32
  }
  func.func @transform_1(%arg0: i32) -> (i32, i32) {
    %c0_i32 = arith.constant 0 : i32
    %c0_i32_0 = arith.constant 0 : i32
    return %arg0, %c0_i32 : i32, i32
  }
  func.func @transform_2(%arg0: i32) -> (i32, i32) {
    %c0_i32 = arith.constant 0 : i32
    %c0_i32_0 = arith.constant 0 : i32
    %c0_i32_1 = arith.constant 0 : i32
    return %c0_i32, %c0_i32_0 : i32, i32
  }
  func.func @transform_3(%arg0: i32) -> (i32, i32) {
    %c0_i32 = arith.constant 0 : i32
    %c0_i32_0 = arith.constant 0 : i32
    %c0_i32_1 = arith.constant 0 : i32
    return %c0_i32, %c0_i32_0 : i32, i32
  }
  func.func @transform_4(%arg0: i32) -> (i32, i32) {
    %c0_i32 = arith.constant 0 : i32
    %c0_i32_0 = arith.constant 0 : i32
    %c0_i32_1 = arith.constant 0 : i32
    return %c0_i32, %c0_i32_0 : i32, i32
  }
  func.func @transform_5(%arg0: i32) -> (i32, i32) {
    %c0_i32 = arith.constant 0 : i32
    %c0_i32_0 = arith.constant 0 : i32
    %c0_i32_1 = arith.constant 0 : i32
    return %c0_i32, %c0_i32_0 : i32, i32
  }
  func.func @transform_6(%arg0: i32) -> (i32, i32) {
    %c0_i32 = arith.constant 0 : i32
    %c0_i32_0 = arith.constant 0 : i32
    return %arg0, %c0_i32 : i32, i32
  }
  func.func @transform_7(%arg0: i32) -> (i32, i32) {
    %c0_i32 = arith.constant 0 : i32
    %c0_i32_0 = arith.constant 0 : i32
    return %arg0, %c0_i32 : i32, i32
  }
}

</mosaic_0001>

<bundles_post_ra>
// kernel: tpu_custom_call.1
= control target key start
LH: loop header
LB: loop body
LE: loop exit
PB: predicated region body
PF: predicated region fallthrough
CT: control target
= control target key end

     0   :  { %13 = vsyncpa [#allocation3], 0  ;;  %s811_s0 = inlined_call_operand.vmem [shape: f32[32,32], index: 0, kind: input, shape index: {}]   ;;  %s812_s1 = inlined_call_operand.vmem [shape: f32[32,16], index: 1, kind: input, shape index: {}]   ;;  %s813_s2 = inlined_call_operand.vmem [shape: f32[32,32], index: 2, kind: input, shape index: {}]   ;;  %s814_s3 = inlined_call_operand.hbm [shape: f32[32,32], index: 3, kind: input, shape index: {}]   ;;  %s815_s4 = inlined_call_operand.vmem [shape: f32[16,32], index: 4, kind: input, shape index: {}]   ;;  %s816_s5 = inlined_call_operand.vmem [shape: f32[32,16], index: 5, kind: input, shape index: {}]   ;;  %s817_s6 = inlined_call_operand.hbm [shape: f32[32,32], index: 6, kind: output, shape index: {0}]   ;;  %s818_s7 = inlined_call_operand.vmem [shape: f32[32,16], index: 7, kind: output, shape index: {1}]  }
   0x1   :  { %14 = vsyncpa [#allocation4], 0  ;;  %s25_s26 = sshll.u32 %s814_s3, 4  ;;  %s641_s27 = smov [#allocation2]   ;;  %s26_s26 = int_to_ptr.hbm [resolvable:$true] %s25_s26 }
   0x2   :  { %s27_s28 = sshll.u32 %s641_s27, 4  ;;  %s642_s29 = smov 128   ;;  %s28_s28 = int_to_ptr.vmem [resolvable:$true] %s27_s28 }
   0x3   :  { %s643_s30 = smov 8  }
   0x4   :  { %33 = dma.hbm_to_vmem [thread:$0]  %s26_s26, 512, %s28_s28, [#allocation3], %s642_s29, %s642_s29, %s643_s30  }
   0x5   :  { %637 = dma.done.wait [#allocation3], 512  }
   0x6   :  { %638 = vsyncadd [#allocation3], 4294966784  ;;  %v183_v0 = vld [vmem:[#allocation2 + $0x18] sm:$0xff]  ;;  %v182_v1 = vld [vmem:[#allocation2 + $0x10] sm:$0xff]  ;;  %vm303_vm0 = vcmask 130048   ;;  %vm50_vm1 = vcmask 261120  }
   0x7   :  { %196 = vmatpush.msra.mxu1 %v183_v0  ;;  %v181_v2 = vld [vmem:[#allocation2 + $0x8] sm:$0xff]  ;;  %v301_v4 = vld [vmem:[%s815_s4] sm:$0xff]  ;;  %v299_v10 = vld [vmem:[%s812_s1 + $0x10] sm:$0xff]  ;;  %s492_s19 = sshll.u32 %s817_s6, 4  ;;  %s493_s19 = int_to_ptr.hbm [resolvable:$true] %s492_s19 }
   0x8   :  { %v302_v3 = vld [vmem:[%s815_s4 + $0x8] sm:$0xff]  ;;  %v297_v5 = vld [vmem:[%s812_s1] sm:$0xff]  ;;  %v44_v11 = vld [vmem:[%s811_s0 + $0x10] sm:$0xff] }
   0x9   :  { %197 = vmatpush.msra.mxu1 %v182_v1  ;;  %330 = vmatpush.msra.mxu2 %v302_v3  ;;  %v180_v6 = vld [vmem:[#allocation2] sm:$0xff]  ;;  %v298_v8 = vld [vmem:[%s812_s1 + $0x8] sm:$0xff]  ;;  %v300_v12 = vld [vmem:[%s812_s1 + $0x18] sm:$0xff] }
   0xa   :  { %v42_v7 = vld [vmem:[%s811_s0] sm:$0xff]  ;;  %v43_v9 = vld [vmem:[%s811_s0 + $0x8] sm:$0xff]  ;;  %v45_v13 = vld [vmem:[%s811_s0 + $0x18] sm:$0xff] }
   0xb   :  { %198 = vmatpush.msra.mxu1 %v181_v2  ;;  %331 = vmatpush.msra.mxu2 %v301_v4  ;;  %v49_v14 = vld [vmem:[%s813_s2 + $0x18] sm:$0xff]  ;;  %v48_v15 = vld [vmem:[%s813_s2 + $0x10] sm:$0xff]  ;;  %v47_v16 = vld [vmem:[%s813_s2 + $0x8] sm:$0xff] }
   0xc   :  { %525 = vmatmul.msk.f32.vlgmr.msra.gmra.mxu2 %vm303_vm0, %v297_v5  ;;  %75 = vmatpush.msra.mxu0 %v49_v14  ;;  %v46_v17 = vld [vmem:[%s813_s2] sm:$0xff]  ;;  %v356_v18 = vld [vmem:[%s816_s5 + $0x18] sm:$0xff]  ;;  %v355_v20 = vld [vmem:[%s816_s5 + $0x10] sm:$0xff] }
   0xd   :  { %199 = vmatpush.msra.mxu1 %v180_v6  ;;  %381 = vmatpush.msra.mxu3 %v356_v18  ;;  %v354_v22 = vld [vmem:[%s816_s5 + $0x8] sm:$0xff]  ;;  %v353_v23 = vld [vmem:[%s816_s5] sm:$0xff]  ;;  %s644_s5 = smov [#allocation5]  }
   0xe   :  { %517 = vmatmul.msk.f32.vlgmr.msra.gmra.mxu1 %vm50_vm1, %v42_v7  ;;  %76 = vmatpush.msra.mxu0 %v48_v15  ;;  %s490_s16 = sshll.u32 %s644_s5, 4  ;;  %s491_s16 = int_to_ptr.vmem [resolvable:$true] %s490_s16 }
   0xf   :  { %382 = vmatpush.msra.mxu3 %v355_v20 }
  0x10   :  { %77 = vmatpush.msra.mxu0 %v47_v16 }
  0x11   :  { %383 = vmatpush.msra.mxu3 %v354_v22 }
  0x12   :  { %78 = vmatpush.msra.mxu0 %v46_v17 }
  0x13   :  { %509 = vmatmul.msk.f32.vlgmr.msra.gmra.mxu0 %vm50_vm1, %v42_v7  ;;  %384 = vmatpush.msra.mxu3 %v353_v23 }
  0x14   :  { %526 = vmatmul.msk.f32.gmra.mxu2 %vm303_vm0, %v298_v8 }
  0x16   :  { %518 = vmatmul.msk.f32.gmra.mxu1 %vm50_vm1, %v43_v9 }
  0x1b   :  { %510 = vmatmul.msk.f32.gmra.mxu0 %vm50_vm1, %v43_v9 }
  0x1c   :  { %527 = vmatmul.msk.f32.gmra.mxu2 %vm303_vm0, %v299_v10 }
  0x1e   :  { %519 = vmatmul.msk.f32.gmra.mxu1 %vm50_vm1, %v44_v11 }
  0x23   :  { %511 = vmatmul.msk.f32.gmra.mxu0 %vm50_vm1, %v44_v11 }
  0x24   :  { %528 = vmatmul.msk.f32.gmra.mxu2 %vm303_vm0, %v300_v12 }
  0x26   :  { %520 = vmatmul.msk.f32.gmra.mxu1 %vm50_vm1, %v45_v13 }
  0x2b   :  { %512 = vmatmul.msk.f32.gmra.mxu0 %vm50_vm1, %v45_v13 }
  0x8b   :  { %v201_v19 = vpop.f32.mrf.mxu1 }
  0x8c   :  { %v521_v21 = vmul.f32 -1.442695, %v201_v19 }
  0x8e   :  { %541 = vpow2.f32 %v521_v21 }
  0x8f   :  { %v333_v39 = vpop.f32.mrf.mxu2 }
  0x93   :  { %v204_v24 = vpop.f32.mrf.mxu1 }
  0x94   :  { %v542_v25 = vpop.eup %541  ;;  %v522_v26 = vmul.f32 -1.442695, %v204_v24 }
  0x95   :  { %v225_v27 = vadd.f32 1.0, %v542_v25 }
  0x96   :  { %543 = vpow2.f32 %v522_v26 }
  0x97   :  { %545 = vrcp.f32 %v225_v27  ;;  %v240_v35 = vand.u32 2147483648, %v225_v27  ;;  %v238_v37 = vand.u32 2147483647, %v225_v27  ;;  %vm234_vm3 = vweird.f32 %v225_v27  ;;  %v336_v61 = vpop.f32.mrf.mxu2 }
  0x99   :  { %v241_v44 = vor.u32 1.1754944e-38, %v240_v35  ;;  %vm239_vm5 = vcmp.eq.f32.partialorder %v238_v37, 8.507059e+37 }
  0x9b   :  { %v757_v28 = vpop.f32.mrf.mxu1 }
  0x9c   :  { %v544_v29 = vpop.eup %543  ;;  %v523_v30 = vmul.f32 -1.442695, %v757_v28 }
  0x9d   :  { %v546_v31 = vpop.eup %545  ;;  %v226_v32 = vadd.f32 1.0, %v544_v29 }
  0x9e   :  { %v230_v33 = vmul.f32 %v546_v31, %v225_v27  ;;  %547 = vpow2.f32 %v523_v30  ;;  %vm235_vm2 = vweird.f32 %v546_v31 }
  0x9f   :  { %549 = vrcp.f32 %v226_v32  ;;  %vm236_vm4 = vmor %vm234_vm3, %vm235_vm2  ;;  %v255_v51 = vand.u32 2147483648, %v226_v32  ;;  %v253_v54 = vand.u32 2147483647, %v226_v32  ;;  %vm249_vm7 = vweird.f32 %v226_v32  ;;  %v339_v16 = vpop.f32.mrf.mxu2 }
  0xa0   :  { %v231_v34 = vsub.f32 1.0, %v230_v33 }
  0xa1   :  { %v256_v59 = vor.u32 1.1754944e-38, %v255_v51  ;;  %vm254_vm9 = vcmp.eq.f32.partialorder %v253_v54, 8.507059e+37 }
  0xa2   :  { %v232_v36 = vmul.f32 %v546_v31, %v231_v34  ;;  %v80_v34 = vpop.f32.mrf.mxu0 }
  0xa3   :  { %v760_v38 = vpop.f32.mrf.mxu1  ;;  %v513_v35 = vmul.f32 -1.442695, %v80_v34 }
  0xa4   :  { %v548_v40 = vpop.eup %547  ;;  %v233_v41 = vadd.f32 %v546_v31, %v232_v36  ;;  %v524_v42 = vmul.f32 -1.442695, %v760_v38 }
  0xa5   :  { %v550_v43 = vpop.eup %549  ;;  %v227_v45 = vadd.f32 1.0, %v548_v40 }
  0xa6   :  { %v237_v46 = vsel %vm236_vm4, %v546_v31, %v233_v41  ;;  %v245_v47 = vmul.f32 %v550_v43, %v226_v32  ;;  %551 = vpow2.f32 %v524_v42  ;;  %vm250_vm6 = vweird.f32 %v550_v43 }
  0xa7   :  { %v242_v48 = vsel %vm239_vm5, %v241_v44, %v237_v46  ;;  %553 = vrcp.f32 %v227_v45  ;;  %vm251_vm8 = vmor %vm249_vm7, %vm250_vm6  ;;  %v270_v4 = vand.u32 2147483648, %v227_v45  ;;  %v268_v7 = vand.u32 2147483647, %v227_v45 }
  0xa8   :  { %v289_v49 = vmul.f32 %v242_v48, %v201_v19  ;;  %v246_v50 = vsub.f32 1.0, %v245_v47  ;;  %vm264_vm11 = vweird.f32 %v227_v45 }
  0xa9   :  { %v271_v11 = vor.u32 1.1754944e-38, %v270_v4  ;;  %vm269_vm13 = vcmp.eq.f32.partialorder %v268_v7, 8.507059e+37 }
  0xaa   :  { %v293_v52 = vmul.f32 1.6666666, %v289_v49  ;;  %v247_v53 = vmul.f32 %v550_v43, %v246_v50  ;;  %v83_v36 = vpop.f32.mrf.mxu0 }
  0xac   :  { %v552_v55 = vpop.eup %551  ;;  %v248_v56 = vadd.f32 %v550_v43, %v247_v53  ;;  %v345_v57 = vmul.f32 %v333_v39, %v293_v52  ;;  %v514_v39 = vmul.f32 -1.442695, %v83_v36 }
  0xad   :  { %v554_v58 = vpop.eup %553  ;;  %v228_v60 = vadd.f32 1.0, %v552_v55 }
  0xae   :  { %v252_v62 = vsel %vm251_vm8, %v550_v43, %v248_v56  ;;  %v260_v63 = vmul.f32 %v554_v58, %v227_v45  ;;  %v349_v0 = vmul.f32 0.9, %v345_v57  ;;  %vm265_vm10 = vweird.f32 %v554_v58 }
  0xaf   :  { %v257_v1 = vsel %vm254_vm9, %v256_v59, %v252_v62  ;;  %555 = vrcp.f32 %v228_v60  ;;  %vm266_vm12 = vmor %vm264_vm11, %vm265_vm10  ;;  %v285_v19 = vand.u32 2147483648, %v228_v60  ;;  %v283_v22 = vand.u32 2147483647, %v228_v60 }
  0xb0   :  { %v290_v2 = vmul.f32 %v257_v1, %v204_v24  ;;  %v261_v3 = vsub.f32 1.0, %v260_v63  ;;  %529 = vmatmul.msk.f32.vlgmr.msra.gmra.mxu3 %vm50_vm1, %v349_v0  ;;  %vm279_vm15 = vweird.f32 %v228_v60  ;;  %557 = vpow2.f32 %v513_v35 }
  0xb1   :  { %v286_v25 = vor.u32 1.1754944e-38, %v285_v19  ;;  %vm284_vm3 = vcmp.eq.f32.partialorder %v283_v22, 8.507059e+37  ;;  %559 = vpow2.f32 %v514_v39 }
  0xb2   :  { %v294_v5 = vmul.f32 1.6666666, %v290_v2  ;;  %v262_v6 = vmul.f32 %v554_v58, %v261_v3  ;;  %v769_v41 = vpop.f32.mrf.mxu0 }
  0xb3   :  { %v515_v42 = vmul.f32 -1.442695, %v769_v41 }
  0xb4   :  { %v263_v8 = vadd.f32 %v554_v58, %v262_v6  ;;  %v346_v9 = vmul.f32 %v336_v61, %v294_v5 }
  0xb5   :  { %v556_v10 = vpop.eup %555 }
  0xb6   :  { %v267_v12 = vsel %vm266_vm12, %v554_v58, %v263_v8  ;;  %v275_v13 = vmul.f32 %v556_v10, %v228_v60  ;;  %v350_v14 = vmul.f32 0.9, %v346_v9  ;;  %vm280_vm14 = vweird.f32 %v556_v10  ;;  %v558_v37 = vpop.eup %557 }
  0xb7   :  { %v272_v15 = vsel %vm269_vm13, %v271_v11, %v267_v12  ;;  %vm281_vm2 = vmor %vm279_vm15, %vm280_vm14  ;;  %v104_v40 = vadd.f32 1.0, %v558_v37 }
  0xb8   :  { %v291_v17 = vmul.f32 %v272_v15, %v757_v28  ;;  %v276_v18 = vsub.f32 1.0, %v275_v13  ;;  %530 = vmatmul.msk.f32.gmra.mxu3 %vm50_vm1, %v350_v14  ;;  %v342_v28 = vpop.f32.mrf.mxu2 }
  0xb9   :  { %561 = vrcp.f32 %v104_v40  ;;  %v119_v46 = vand.u32 2147483648, %v104_v40  ;;  %vm113_vm4 = vweird.f32 %v104_v40  ;;  %v117_v48 = vand.u32 2147483647, %v104_v40 }
  0xba   :  { %v295_v20 = vmul.f32 1.6666666, %v291_v17  ;;  %v277_v21 = vmul.f32 %v556_v10, %v276_v18  ;;  %563 = vpow2.f32 %v515_v42  ;;  %v772_v51 = vpop.f32.mrf.mxu0 }
  0xbb   :  { %v120_v50 = vor.u32 1.1754944e-38, %v119_v46  ;;  %vm118_vm7 = vcmp.eq.f32.partialorder %v117_v48, 8.507059e+37  ;;  %v516_v54 = vmul.f32 -1.442695, %v772_v51 }
  0xbc   :  { %v278_v23 = vadd.f32 %v556_v10, %v277_v21  ;;  %v347_v24 = vmul.f32 %v339_v16, %v295_v20 }
  0xbe   :  { %v282_v26 = vsel %vm281_vm2, %v556_v10, %v278_v23  ;;  %v351_v27 = vmul.f32 0.9, %v347_v24 }
  0xbf   :  { %v287_v29 = vsel %vm284_vm3, %v286_v25, %v282_v26 }
  0xc0   :  { %v292_v30 = vmul.f32 %v287_v29, %v760_v38  ;;  %531 = vmatmul.msk.f32.gmra.mxu3 %vm50_vm1, %v351_v27  ;;  %v560_v38 = vpop.eup %559 }
  0xc1   :  { %v562_v43 = vpop.eup %561  ;;  %v105_v44 = vadd.f32 1.0, %v560_v38 }
  0xc2   :  { %v296_v31 = vmul.f32 1.6666666, %v292_v30  ;;  %v109_v45 = vmul.f32 %v562_v43, %v104_v40  ;;  %vm114_vm5 = vweird.f32 %v562_v43  ;;  %v564_v52 = vpop.eup %563 }
  0xc3   :  { %565 = vrcp.f32 %v105_v44  ;;  %vm115_vm6 = vmor %vm113_vm4, %vm114_vm5  ;;  %v106_v56 = vadd.f32 1.0, %v564_v52  ;;  %vm128_vm8 = vweird.f32 %v105_v44  ;;  %v134_v60 = vand.u32 2147483648, %v105_v44 }
  0xc4   :  { %v348_v32 = vmul.f32 %v342_v28, %v296_v31  ;;  %v110_v47 = vsub.f32 1.0, %v109_v45  ;;  %567 = vpow2.f32 %v516_v54  ;;  %v132_v63 = vand.u32 2147483647, %v105_v44 }
  0xc5   :  { %569 = vrcp.f32 %v106_v56  ;;  %v135_v2 = vor.u32 1.1754944e-38, %v134_v60  ;;  %vm143_vm12 = vweird.f32 %v106_v56  ;;  %v149_v10 = vand.u32 2147483648, %v106_v56 }
  0xc6   :  { %v352_v33 = vmul.f32 0.9, %v348_v32  ;;  %v111_v49 = vmul.f32 %v562_v43, %v110_v47  ;;  %vm133_vm11 = vcmp.eq.f32.partialorder %v132_v63, 8.507059e+37  ;;  %v147_v13 = vand.u32 2147483647, %v106_v56 }
  0xc7   :  { %v150_v16 = vor.u32 1.1754944e-38, %v149_v10 }
  0xc8   :  { %532 = vmatmul.msk.f32.gmra.mxu3 %vm50_vm1, %v352_v33  ;;  %v112_v53 = vadd.f32 %v562_v43, %v111_v49  ;;  %vm148_vm15 = vcmp.eq.f32.partialorder %v147_v13, 8.507059e+37 }
  0xc9   :  { %v566_v55 = vpop.eup %565 }
  0xca   :  { %v116_v57 = vsel %vm115_vm6, %v562_v43, %v112_v53  ;;  %v124_v58 = vmul.f32 %v566_v55, %v105_v44  ;;  %vm129_vm9 = vweird.f32 %v566_v55  ;;  %v568_v3 = vpop.eup %567 }
  0xcb   :  { %v121_v59 = vsel %vm118_vm7, %v120_v50, %v116_v57  ;;  %vm130_vm10 = vmor %vm128_vm8, %vm129_vm9  ;;  %v570_v5 = vpop.eup %569  ;;  %v107_v6 = vadd.f32 1.0, %v568_v3 }
  0xcc   :  { %v168_v61 = vmul.f32 %v121_v59, %v80_v34  ;;  %v125_v62 = vsub.f32 1.0, %v124_v58  ;;  %v139_v8 = vmul.f32 %v570_v5, %v106_v56  ;;  %vm144_vm13 = vweird.f32 %v570_v5 }
  0xcd   :  { %571 = vrcp.f32 %v107_v6  ;;  %vm145_vm14 = vmor %vm143_vm12, %vm144_vm13  ;;  %vm158_vm2 = vweird.f32 %v107_v6  ;;  %v164_v22 = vand.u32 2147483648, %v107_v6  ;;  %v162_v25 = vand.u32 2147483647, %v107_v6 }
  0xce   :  { %v172_v0 = vmul.f32 1.6666666, %v168_v61  ;;  %v126_v1 = vmul.f32 %v566_v55, %v125_v62  ;;  %v140_v12 = vsub.f32 1.0, %v139_v8 }
  0xcf   :  { %v165_v29 = vor.u32 1.1754944e-38, %v164_v22  ;;  %vm163_vm5 = vcmp.eq.f32.partialorder %v162_v25, 8.507059e+37 }
  0xd0   :  { %176 = vst.msk [vmem:[#allocation5] sm:$0xff] %vm50_vm1, %v172_v0  ;;  %v127_v4 = vadd.f32 %v566_v55, %v126_v1  ;;  %v141_v15 = vmul.f32 %v570_v5, %v140_v12 }
  0xd2   :  { %v131_v7 = vsel %vm130_vm10, %v566_v55, %v127_v4  ;;  %v142_v17 = vadd.f32 %v570_v5, %v141_v15 }
  0xd3   :  { %v136_v9 = vsel %vm133_vm11, %v135_v2, %v131_v7  ;;  %v572_v18 = vpop.eup %571 }
  0xd4   :  { %v169_v11 = vmul.f32 %v136_v9, %v83_v36  ;;  %v146_v19 = vsel %vm145_vm14, %v570_v5, %v142_v17  ;;  %v154_v20 = vmul.f32 %v572_v18, %v107_v6  ;;  %vm159_vm3 = vweird.f32 %v572_v18 }
  0xd5   :  { %v151_v21 = vsel %vm148_vm15, %v150_v16, %v146_v19  ;;  %vm160_vm4 = vmor %vm158_vm2, %vm159_vm3 }
  0xd6   :  { %v173_v14 = vmul.f32 1.6666666, %v169_v11  ;;  %v170_v23 = vmul.f32 %v151_v21, %v769_v41  ;;  %v155_v24 = vsub.f32 1.0, %v154_v20 }
  0xd8   :  { %177 = vst.msk [vmem:[#allocation5 + $0x8] sm:$0xff] %vm50_vm1, %v173_v14  ;;  %v174_v26 = vmul.f32 1.6666666, %v170_v23  ;;  %v156_v27 = vmul.f32 %v572_v18, %v155_v24 }
  0xda   :  { %178 = vst.msk [vmem:[#allocation5 + $0x10] sm:$0xff] %vm50_vm1, %v174_v26  ;;  %v157_v30 = vadd.f32 %v572_v18, %v156_v27 }
  0xdc   :  { %v161_v28 = vsel %vm160_vm4, %v572_v18, %v157_v30 }
  0xdd   :  { %v166_v31 = vsel %vm163_vm5, %v165_v29, %v161_v28 }
  0xde   :  { %v171_v32 = vmul.f32 %v166_v31, %v772_v51 }
  0xe0   :  { %v175_v33 = vmul.f32 1.6666666, %v171_v32 }
  0xe2   :  { %179 = vst.msk [vmem:[#allocation5 + $0x18] sm:$0xff] %vm50_vm1, %v175_v33 }
  0xe3   :  { %498 = dma.vmem_to_hbm [thread:$0]  %s491_s16, 512, %s493_s19, [#allocation4], %s642_s29, %s642_s29, %s643_s30  }
 0x133   :  { %v386_v34 = vpop.f32.mrf.mxu3 }
 0x134   :  { %v533_v35 = vmul.f32 -1.442695, %v386_v34 }
 0x136   :  { %573 = vpow2.f32 %v533_v35 }
 0x13b   :  { %v389_v36 = vpop.f32.mrf.mxu3 }
 0x13c   :  { %v574_v37 = vpop.eup %573  ;;  %v534_v39 = vmul.f32 -1.442695, %v389_v36 }
 0x13d   :  { %v410_v40 = vadd.f32 1.0, %v574_v37 }
 0x13e   :  { %575 = vpow2.f32 %v534_v39 }
 0x13f   :  { %577 = vrcp.f32 %v410_v40  ;;  %v425_v47 = vand.u32 2147483648, %v410_v40  ;;  %v423_v49 = vand.u32 2147483647, %v410_v40  ;;  %vm419_vm6 = vweird.f32 %v410_v40 }
 0x141   :  { %v426_v55 = vor.u32 1.1754944e-38, %v425_v47  ;;  %vm424_vm8 = vcmp.eq.f32.partialorder %v423_v49, 8.507059e+37 }
 0x143   :  { %v787_v41 = vpop.f32.mrf.mxu3 }
 0x144   :  { %v576_v38 = vpop.eup %575  ;;  %v535_v42 = vmul.f32 -1.442695, %v787_v41 }
 0x145   :  { %v578_v43 = vpop.eup %577  ;;  %v411_v44 = vadd.f32 1.0, %v576_v38 }
 0x146   :  { %v415_v45 = vmul.f32 %v578_v43, %v410_v40  ;;  %579 = vpow2.f32 %v535_v42  ;;  %vm420_vm1 = vweird.f32 %v578_v43 }
 0x147   :  { %581 = vrcp.f32 %v411_v44  ;;  %vm421_vm7 = vmor %vm419_vm6, %vm420_vm1  ;;  %v440_v62 = vand.u32 2147483648, %v411_v44  ;;  %v438_v1 = vand.u32 2147483647, %v411_v44  ;;  %vm434_vm10 = vweird.f32 %v411_v44 }
 0x148   :  { %v416_v46 = vsub.f32 1.0, %v415_v45 }
 0x149   :  { %v441_v5 = vor.u32 1.1754944e-38, %v440_v62  ;;  %vm439_vm12 = vcmp.eq.f32.partialorder %v438_v1, 8.507059e+37 }
 0x14a   :  { %v417_v48 = vmul.f32 %v578_v43, %v416_v46 }
 0x14b   :  { %v790_v50 = vpop.f32.mrf.mxu3 }
 0x14c   :  { %v580_v51 = vpop.eup %579  ;;  %v418_v52 = vadd.f32 %v578_v43, %v417_v48  ;;  %v536_v53 = vmul.f32 -1.442695, %v790_v50 }
 0x14d   :  { %v582_v54 = vpop.eup %581  ;;  %v412_v56 = vadd.f32 1.0, %v580_v51 }
 0x14e   :  { %v422_v57 = vsel %vm421_vm7, %v578_v43, %v418_v52  ;;  %v430_v58 = vmul.f32 %v582_v54, %v411_v44  ;;  %583 = vpow2.f32 %v536_v53  ;;  %vm435_vm9 = vweird.f32 %v582_v54 }
 0x14f   :  { %v427_v59 = vsel %vm424_vm8, %v426_v55, %v422_v57  ;;  %585 = vrcp.f32 %v412_v56  ;;  %vm436_vm11 = vmor %vm434_vm10, %vm435_vm9  ;;  %v455_v12 = vand.u32 2147483648, %v412_v56  ;;  %v453_v15 = vand.u32 2147483647, %v412_v56 }
 0x150   :  { %v474_v60 = vmul.f32 %v427_v59, %v386_v34  ;;  %v431_v61 = vsub.f32 1.0, %v430_v58  ;;  %vm449_vm14 = vweird.f32 %v412_v56 }
 0x151   :  { %v456_v18 = vor.u32 1.1754944e-38, %v455_v12  ;;  %vm454_vm2 = vcmp.eq.f32.partialorder %v453_v15, 8.507059e+37 }
 0x152   :  { %v478_v63 = vmul.f32 1.6666666, %v474_v60  ;;  %v432_v0 = vmul.f32 %v582_v54, %v431_v61 }
 0x154   :  { %v584_v2 = vpop.eup %583  ;;  %482 = vst.msk [vmem:[%s818_s7] sm:$0xff] %vm303_vm0, %v478_v63  ;;  %v433_v3 = vadd.f32 %v582_v54, %v432_v0 }
 0x155   :  { %v586_v4 = vpop.eup %585  ;;  %v413_v6 = vadd.f32 1.0, %v584_v2 }
 0x156   :  { %v437_v7 = vsel %vm436_vm11, %v582_v54, %v433_v3  ;;  %v445_v8 = vmul.f32 %v586_v4, %v412_v56  ;;  %vm450_vm13 = vweird.f32 %v586_v4 }
 0x157   :  { %v442_v9 = vsel %vm439_vm12, %v441_v5, %v437_v7  ;;  %587 = vrcp.f32 %v413_v6  ;;  %vm451_vm15 = vmor %vm449_vm14, %vm450_vm13  ;;  %v470_v24 = vand.u32 2147483648, %v413_v6  ;;  %v468_v27 = vand.u32 2147483647, %v413_v6 }
 0x158   :  { %v475_v10 = vmul.f32 %v442_v9, %v389_v36  ;;  %v446_v11 = vsub.f32 1.0, %v445_v8  ;;  %vm464_vm4 = vweird.f32 %v413_v6 }
 0x159   :  { %v471_v30 = vor.u32 1.1754944e-38, %v470_v24  ;;  %vm469_vm1 = vcmp.eq.f32.partialorder %v468_v27, 8.507059e+37 }
 0x15a   :  { %v479_v13 = vmul.f32 1.6666666, %v475_v10  ;;  %v447_v14 = vmul.f32 %v586_v4, %v446_v11 }
 0x15c   :  { %483 = vst.msk [vmem:[%s818_s7 + $0x8] sm:$0xff] %vm303_vm0, %v479_v13  ;;  %v448_v16 = vadd.f32 %v586_v4, %v447_v14 }
 0x15d   :  { %v588_v17 = vpop.eup %587 }
 0x15e   :  { %v452_v19 = vsel %vm451_vm15, %v586_v4, %v448_v16  ;;  %v460_v20 = vmul.f32 %v588_v17, %v413_v6  ;;  %vm465_vm3 = vweird.f32 %v588_v17 }
 0x15f   :  { %v457_v21 = vsel %vm454_vm2, %v456_v18, %v452_v19  ;;  %vm466_vm5 = vmor %vm464_vm4, %vm465_vm3 }
 0x160   :  { %v476_v22 = vmul.f32 %v457_v21, %v787_v41  ;;  %v461_v23 = vsub.f32 1.0, %v460_v20 }
 0x162   :  { %v480_v25 = vmul.f32 1.6666666, %v476_v22  ;;  %v462_v26 = vmul.f32 %v588_v17, %v461_v23 }
 0x164   :  { %484 = vst.msk [vmem:[%s818_s7 + $0x10] sm:$0xff] %vm303_vm0, %v480_v25  ;;  %v463_v29 = vadd.f32 %v588_v17, %v462_v26 }
 0x166   :  { %v467_v28 = vsel %vm466_vm5, %v588_v17, %v463_v29 }
 0x167   :  { %v472_v31 = vsel %vm469_vm1, %v471_v30, %v467_v28 }
 0x168   :  { %v477_v32 = vmul.f32 %v472_v31, %v790_v50 }
 0x16a   :  { %v481_v33 = vmul.f32 1.6666666, %v477_v32 }
 0x16c   :  { %485 = vst.msk [vmem:[%s818_s7 + $0x18] sm:$0xff] %vm303_vm0, %v481_v33 }
 0x16d   :  { %639 = dma.done.wait [#allocation4], 512  }
 0x16e   :  { %640 = vsyncadd [#allocation4], 4294966784 }
 0x16f   :  { %507 = vsyncpa [#allocation3], 1 }
 0x170   :  { %508 = vsyncpa [#allocation4], 1 }

</bundles_post_ra>
